<compile_context>
chip_gen: v5e
topology: v5e:2x2
jax: 0.10.0
libtpu: 0.0.40
codegen_flags: <defaults>
</compile_context>

<pallas_src>
import jax
import jax.numpy as jnp
from jax.experimental import pallas as pl
from jax.experimental.pallas import tpu as pltpu

LANE = 128      # TPU lane width
MAX_TM = 512    # max batch-tile rows


def _round_up(n, m):
    return ((n + m - 1) // m) * m


def mlp_kernel(x_ref, w1_ref, b1_ref, w2_ref, b2_ref, o_ref):
    # fc1 on the MXU: bf16 operands, f32 accumulation.
    x_bf = x_ref[...].astype(jnp.bfloat16)
    h = jnp.dot(x_bf, w1_ref[...], preferred_element_type=jnp.float32)
    # Bias add + ReLU on the VPU in f32.
    h = jnp.maximum(h + b1_ref[...], 0.0)
    # fc2 on the MXU: downcast activations to bf16, accumulate in f32.
    o = jnp.dot(h.astype(jnp.bfloat16), w2_ref[...],
                preferred_element_type=jnp.float32)
    o_ref[...] = (o + b2_ref[...]).astype(o_ref.dtype)


def prepare_params(w1, b1, w2, b2):
    """One-time repack of PyTorch-layout Linear params into kernel layout.

    w1: (H, In), b1: (H,), w2: (Out, H), b2: (Out,)  ->
      w1_t: (In,  H_p)   bf16   (hidden zero-padded to a multiple of 128)
      b1_r: (1,   H_p)   f32
      w2_t: (H_p, Out_p) bf16   (output zero-padded to a multiple of 128)
      b2_r: (1,   Out_p) f32
      out_features: Out  (to slice the lane-padded output)
    """
    H, In = w1.shape
    Out, H2 = w2.shape
    assert H == H2 and b1.shape == (H,) and b2.shape == (Out,)
    h_p = _round_up(max(H, LANE), LANE)
    out_p = _round_up(max(Out, LANE), LANE)

    w1_t = jnp.zeros((In, h_p), jnp.bfloat16)
    w1_t = w1_t.at[:, :H].set(jnp.asarray(w1.T, jnp.bfloat16))      # (In, H_p)
    b1_r = jnp.zeros((1, h_p), jnp.float32)
    b1_r = b1_r.at[:, :H].set(jnp.asarray(b1, jnp.float32))
    w2_t = jnp.zeros((h_p, out_p), jnp.bfloat16)
    w2_t = w2_t.at[:H, :Out].set(jnp.asarray(w2.T, jnp.bfloat16))   # (H_p, Out_p)
    b2_r = jnp.zeros((1, out_p), jnp.float32)
    b2_r = b2_r.at[:, :Out].set(jnp.asarray(b2, jnp.float32))
    return w1_t, b1_r, w2_t, b2_r, Out


def mlp_forward(x, w1_t, b1_r, w2_t, b2_r, out_features):
    """x: (B, In) -> (B, out_features). Params come from prepare_params()."""
    B, In = x.shape
    In_w, h_p = w1_t.shape
    h_p2, out_p = w2_t.shape
    assert In == In_w and h_p == h_p2

    # Batch tile: whole batch when small (block == full dim is always legal);
    # otherwise MAX_TM rows (multiple of 8 sublanes). Ragged tail is fine.
    tm = B if B <= MAX_TM else MAX_TM
    grid = (pl.cdiv(B, tm),)

    out_dtype = x.dtype
    xb = jnp.dtype(x.dtype).itemsize
    ob = jnp.dtype(out_dtype).itemsize

    # VMEM budget: weights/biases (pipeliner double-buffers them, though the
    # constant index_map means they are only DMA'd once) + double-buffered
    # x/out tiles + the (tm, h_p) f32 intermediate.
    # TODO(synk): if the weights ever exceed VMEM (v7x: 64 MiB), add an
    # H-split grid axis with an f32 accumulator scratch instead of keeping
    # both weight matrices fully resident.
    weight_bytes = (w1_t.size + w2_t.size) * 2 + (b1_r.size + b2_r.size) * 4
    vmem_bytes = (2 * weight_bytes
                  + 2 * (tm * In * xb + tm * out_p * ob)
                  + tm * h_p * 4)
    vmem_limit = int(min(max(2 * vmem_bytes, 32 << 20), 48 << 20))

    cost = pl.CostEstimate(
        flops=2 * B * (In * h_p + h_p * out_p),
        transcendentals=0,
        bytes_accessed=int(x.size * xb + weight_bytes + B * out_p * ob),
    )

    out_padded = pl.pallas_call(
        mlp_kernel,
        out_shape=jax.ShapeDtypeStruct((B, out_p), out_dtype),
        grid_spec=pltpu.PrefetchScalarGridSpec(
            num_scalar_prefetch=0,
            grid=grid,
            in_specs=[
                pl.BlockSpec((tm, In), lambda i: (i, 0)),      # x: streamed per tile
                pl.BlockSpec((In, h_p), lambda i: (0, 0)),     # w1: VMEM-resident
                pl.BlockSpec((1, h_p), lambda i: (0, 0)),      # b1: VMEM-resident
                pl.BlockSpec((h_p, out_p), lambda i: (0, 0)),  # w2: VMEM-resident
                pl.BlockSpec((1, out_p), lambda i: (0, 0)),    # b2: VMEM-resident
            ],
            out_specs=pl.BlockSpec((tm, out_p), lambda i: (i, 0)),
        ),
        compiler_params=pltpu.CompilerParams(
            dimension_semantics=("parallel",),   # megacore-shardable on v7x
            vmem_limit_bytes=vmem_limit),
        cost_estimate=cost,
    )(x, w1_t, b1_r, w2_t, b2_r)

    # Glue: drop the lane-padding columns.
    return out_padded[:, :out_features]


def init_params(key, input_size, hidden_size, output_size, dtype=jnp.float32):
    """Deterministic PyTorch-style uniform(-1/sqrt(fan_in), 1/sqrt(fan_in)) init."""
    k1, k2, k3, k4 = jax.random.split(key, 4)
    bound1 = 1.0 / (input_size ** 0.5)
    bound2 = 1.0 / (hidden_size ** 0.5)
    w1 = jax.random.uniform(k1, (hidden_size, input_size), dtype,
                            minval=-bound1, maxval=bound1)
    b1 = jax.random.uniform(k2, (hidden_size,), dtype,
                            minval=-bound1, maxval=bound1)
    w2 = jax.random.uniform(k3, (output_size, hidden_size), dtype,
                            minval=-bound2, maxval=bound2)
    b2 = jax.random.uniform(k4, (output_size,), dtype,
                            minval=-bound2, maxval=bound2)
    return w1, b1, w2, b2


def ref_forward(x, w1, b1, w2, b2):
    """Reference with the same bf16-operand / f32-accumulate numerics."""
    bf = lambda a: a.astype(jnp.bfloat16)
    h = jnp.dot(bf(x), bf(w1.T), preferred_element_type=jnp.float32) + b1
    h = jnp.maximum(h, 0.0)
    return jnp.dot(bf(h), bf(w2.T), preferred_element_type=jnp.float32) + b2


if __name__ == "__main__":
    key = jax.random.PRNGKey(0)
    input_size, hidden_size, output_size = 32, 64, 16

    kx, kp, kx2 = jax.random.split(key, 3)
    w1, b1, w2, b2 = init_params(kp, input_size, hidden_size, output_size)
    params = prepare_params(w1, b1, w2, b2)   # one-time transpose/pad/bf16 cast

    # Small demo batch (single tile).
    x = jax.random.normal(kx, (8, input_size), jnp.float32)
    out = mlp_forward(x, *params)
    jax.block_until_ready(out)
    ref = ref_forward(x, w1, b1, w2, b2)
    assert out.shape == (8, output_size)
    assert jnp.allclose(out, ref, atol=5e-3, rtol=5e-3), \
        float(jnp.max(jnp.abs(out - ref)))

    # Larger batch: exercises the tiled grid (2 steps) with a ragged last tile.
    x2 = jax.random.normal(kx2, (520, input_size), jnp.float32)
    out2 = mlp_forward(x2, *params)
    jax.block_until_ready(out2)
    ref2 = ref_forward(x2, w1, b1, w2, b2)
    assert out2.shape == (520, output_size)
    assert jnp.allclose(out2, ref2, atol=5e-3, rtol=5e-3), \
        float(jnp.max(jnp.abs(out2 - ref2)))

    print("KERNEL_OK")
</pallas_src>

<mosaic_0001>
module attributes {stable_mosaic.version = 11 : i64} {
  func.func @mlp_kernel(%arg0: i32, %arg1: memref<8x32xf32, #tpu.memory_space<vmem>>, %arg2: memref<32x128xbf16, #tpu.memory_space<vmem>>, %arg3: memref<1x128xf32, #tpu.memory_space<vmem>>, %arg4: memref<128x128xbf16, #tpu.memory_space<vmem>>, %arg5: memref<1x128xf32, #tpu.memory_space<vmem>>, %arg6: memref<8x128xf32, #tpu.memory_space<vmem>>) attributes {dimension_semantics = [#tpu.dimension_semantics<parallel>], iteration_bounds = array<i64: 1>, scalar_prefetch = 0 : i64, scratch_operands = 0 : i64, tpu.core_type = #tpu.core_type<tc>, window_params = [{transform_indices = @transform_0, window_bounds = array<i64: 8, 32>}, {pipeline_mode = #tpu.pipeline_mode<synchronous>, transform_indices = @transform_1, window_bounds = array<i64: 32, 128>}, {pipeline_mode = #tpu.pipeline_mode<synchronous>, transform_indices = @transform_2, window_bounds = array<i64: 1, 128>}, {pipeline_mode = #tpu.pipeline_mode<synchronous>, transform_indices = @transform_3, window_bounds = array<i64: 128, 128>}, {pipeline_mode = #tpu.pipeline_mode<synchronous>, transform_indices = @transform_4, window_bounds = array<i64: 1, 128>}, {transform_indices = @transform_5, window_bounds = array<i64: 8, 128>}]} {
    %c0 = arith.constant 0 : index
    %c0_0 = arith.constant 0 : index
    %0 = vector.load %arg1[%c0, %c0_0] : memref<8x32xf32, #tpu.memory_space<vmem>>, vector<8x32xf32>
    %1 = arith.truncf %0 : vector<8x32xf32> to vector<8x32xbf16>
    %c0_1 = arith.constant 0 : index
    %c0_2 = arith.constant 0 : index
    %2 = vector.load %arg2[%c0_1, %c0_2] : memref<32x128xbf16, #tpu.memory_space<vmem>>, vector<32x128xbf16>
    %cst = arith.constant dense<0.000000e+00> : vector<8x128xf32>
    %3 = tpu.matmul %1, %2, %cst {dimension_numbers = #tpu.dot_dimension_numbers<[1], [0], [0], [1], [0, 0, 1, 1], [], []>} : vector<8x32xbf16>, vector<32x128xbf16>, vector<8x128xf32> -> vector<8x128xf32>
    %c0_3 = arith.constant 0 : index
    %c0_4 = arith.constant 0 : index
    %4 = vector.load %arg3[%c0_3, %c0_4] : memref<1x128xf32, #tpu.memory_space<vmem>>, vector<1x128xf32>
    %5 = vector.broadcast %4 : vector<1x128xf32> to vector<8x128xf32>
    %6 = arith.addf %3, %5 : vector<8x128xf32>
    %cst_5 = arith.constant 0.000000e+00 : f32
    %7 = vector.broadcast %cst_5 : f32 to vector<8x128xf32>
    %8 = arith.maximumf %6, %7 : vector<8x128xf32>
    %9 = arith.truncf %8 : vector<8x128xf32> to vector<8x128xbf16>
    %c0_6 = arith.constant 0 : index
    %c0_7 = arith.constant 0 : index
    %10 = vector.load %arg4[%c0_6, %c0_7] : memref<128x128xbf16, #tpu.memory_space<vmem>>, vector<128x128xbf16>
    %cst_8 = arith.constant dense<0.000000e+00> : vector<8x128xf32>
    %11 = tpu.matmul %9, %10, %cst_8 {dimension_numbers = #tpu.dot_dimension_numbers<[1], [0], [0], [1], [0, 0, 1, 1], [], []>} : vector<8x128xbf16>, vector<128x128xbf16>, vector<8x128xf32> -> vector<8x128xf32>
    %c0_9 = arith.constant 0 : index
    %c0_10 = arith.constant 0 : index
    %12 = vector.load %arg5[%c0_9, %c0_10] : memref<1x128xf32, #tpu.memory_space<vmem>>, vector<1x128xf32>
    %13 = vector.broadcast %12 : vector<1x128xf32> to vector<8x128xf32>
    %14 = arith.addf %11, %13 : vector<8x128xf32>
    %c0_11 = arith.constant 0 : index
    %c0_12 = arith.constant 0 : index
    %15 = vector.load %arg6[%c0_11, %c0_12] : memref<8x128xf32, #tpu.memory_space<vmem>>, vector<8x128xf32>
    tpu.vector_store %arg6[%c0_11, %c0_12], %14 {strides = array<i32>} : memref<8x128xf32, #tpu.memory_space<vmem>>, vector<8x128xf32>,
    return
  }
  func.func @transform_0(%arg0: i32) -> (i32, i32) {
    %c0_i32 = arith.constant 0 : i32
    %c0_i32_0 = arith.constant 0 : i32
    return %arg0, %c0_i32 : i32, i32
  }
  func.func @transform_1(%arg0: i32) -> (i32, i32) {
    %c0_i32 = arith.constant 0 : i32
    %c0_i32_0 = arith.constant 0 : i32
    %c0_i32_1 = arith.constant 0 : i32
    return %c0_i32, %c0_i32_0 : i32, i32
  }
  func.func @transform_2(%arg0: i32) -> (i32, i32) {
    %c0_i32 = arith.constant 0 : i32
    %c0_i32_0 = arith.constant 0 : i32
    %c0_i32_1 = arith.constant 0 : i32
    return %c0_i32, %c0_i32_0 : i32, i32
  }
  func.func @transform_3(%arg0: i32) -> (i32, i32) {
    %c0_i32 = arith.constant 0 : i32
    %c0_i32_0 = arith.constant 0 : i32
    %c0_i32_1 = arith.constant 0 : i32
    return %c0_i32, %c0_i32_0 : i32, i32
  }
  func.func @transform_4(%arg0: i32) -> (i32, i32) {
    %c0_i32 = arith.constant 0 : i32
    %c0_i32_0 = arith.constant 0 : i32
    %c0_i32_1 = arith.constant 0 : i32
    return %c0_i32, %c0_i32_0 : i32, i32
  }
  func.func @transform_5(%arg0: i32) -> (i32, i32) {
    %c0_i32 = arith.constant 0 : i32
    %c0_i32_0 = arith.constant 0 : i32
    return %arg0, %c0_i32 : i32, i32
  }
}

</mosaic_0001>

<bundles_post_ra>
// kernel: tpu_custom_call.1
= control target key start
LH: loop header
LB: loop body
LE: loop exit
PB: predicated region body
PF: predicated region fallthrough
CT: control target
= control target key end

     0   :  { %10 = vsyncpa [#allocation3], 0  ;;  %s423_s0 = inlined_call_operand.hbm [shape: f32[8,32], index: 0, kind: input, shape index: {}]   ;;  %s424_s1 = inlined_call_operand.hbm [shape: bf16[32,128], index: 1, kind: input, shape index: {}]   ;;  %s425_s2 = inlined_call_operand.vmem [shape: f32[1,128], index: 2, kind: input, shape index: {}]   ;;  %s426_s3 = inlined_call_operand.hbm [shape: bf16[128,128], index: 3, kind: input, shape index: {}]   ;;  %s427_s4 = inlined_call_operand.vmem [shape: f32[1,128], index: 4, kind: input, shape index: {}]   ;;  %s428_s5 = inlined_call_operand.hbm [shape: f32[8,128], index: 5, kind: output, shape index: {}]  }
   0x1   :  { %11 = vsyncpa [#allocation6], 0  ;;  %s28_s20 = sshll.u32 %s424_s1, 4  ;;  %s29_s20 = int_to_ptr.hbm [resolvable:$true] %s28_s20 }
   0x2   :  { %12 = vsyncpa [#allocation4], 0  ;;  %s369_s21 = smov [#allocation5]   ;;  %s18_s25 = sshll.u32 %s423_s0, 4  ;;  %s19_s25 = int_to_ptr.hbm [resolvable:$true] %s18_s25 }
   0x3   :  { %s30_s22 = sshll.u32 %s369_s21, 4  ;;  %s370_s26 = smov 64   ;;  %s31_s22 = int_to_ptr.vmem [resolvable:$true] %s30_s22 }
   0x4   :  { %s371_s27 = smov 4   ;;  %s372_s28 = smov [#allocation2]  }
   0x5   :  { %36 = dma.hbm_to_vmem [thread:$0]  %s29_s20, 256, %s31_s22, [#allocation6], %s370_s26, %s370_s26, %s371_s27  }
   0x6   :  { %s20_s29 = sshll.u32 %s372_s28, 4  ;;  %s43_s7 = sshll.u32 %s426_s3, 4  ;;  %s21_s29 = int_to_ptr.vmem [resolvable:$true] %s20_s29  ;;  %s44_s7 = int_to_ptr.hbm [resolvable:$true] %s43_s7 }
   0x7   :  { %23 = dma.hbm_to_vmem [thread:$0]  %s19_s25, 128, %s21_s29, [#allocation3]  }
   0x8   :  { %s373_s1 = smov [#allocation7]  }
   0x9   :  { %s45_s8 = sshll.u32 %s373_s1, 4  ;;  %s46_s8 = int_to_ptr.vmem [resolvable:$true] %s45_s8 }
   0xa   :  { %51 = dma.hbm_to_vmem [thread:$0]  %s44_s7, 1024, %s46_s8, [#allocation6], %s370_s26, %s370_s26, %s371_s27  }
   0xb   :  { %363 = dma.done.wait [#allocation3], 128  }
   0xc   :  { %364 = vsyncadd [#allocation3], 4294967168 }
   0xd   :  { %365 = dma.done.wait [#allocation6], 1280  }
   0xe   :  { %366 = vsyncadd [#allocation6], 4294966016  ;;  %v250_v0 = vld [vmem:[#allocation5 + $0x8] sm:$0xff]  ;;  %v249_v2 = vld [vmem:[#allocation5] sm:$0xff]  ;;  %vm89_vm0 = vcmask 261120   ;;  %s374_s11 = smov [#allocation8]  }
   0xf   :  { %v258_v1 = vld [vmem:[#allocation7 + $0x38] sm:$0xff]  ;;  %99 = vmatpush.bf16.msra.mxu0 %v250_v0  ;;  %v67_v3 = vld [vmem:[#allocation2] sm:$0xff]  ;;  %v257_v4 = vld [vmem:[#allocation7 + $0x30] sm:$0xff]  ;;  %s195_s12 = sshll.u32 %s374_s11, 4  ;;  %s197_s15 = sshll.u32 %s428_s5, 4  ;;  %s196_s12 = int_to_ptr.vmem [resolvable:$true] %s195_s12  ;;  %s198_s15 = int_to_ptr.hbm [resolvable:$true] %s197_s15 }
  0x10   :  { %176 = vmatpush.bf16.msra.mxu1 %v258_v1  ;;  %v68_v5 = vpack.c.bf16 %v67_v3, %v67_v3  ;;  %v256_v6 = vld [vmem:[#allocation7 + $0x28] sm:$0xff]  ;;  %v255_v7 = vld [vmem:[#allocation7 + $0x20] sm:$0xff]  ;;  %v254_v8 = vld [vmem:[#allocation7 + $0x18] sm:$0xff] }
  0x11   :  { %v253_v9 = vld [vmem:[#allocation7 + $0x10] sm:$0xff]  ;;  %v252_v10 = vld [vmem:[#allocation7 + $0x8] sm:$0xff]  ;;  %v251_v11 = vld [vmem:[#allocation7] sm:$0xff] }
  0x12   :  { %v265_v12 = vld [vmem:[%s425_s2] ss:$0 sm:$0xff] }
  0x13   :  { %100 = vmatpush.bf16.msra.mxu0 %v249_v2  ;;  %v266_v18 = vld [vmem:[%s427_s4] ss:$0 sm:$0xff] }
  0x14   :  { %177 = vmatpush.bf16.msra.mxu1 %v257_v4 }
  0x16   :  { %216 = vmatmul.msk.bf16.vlgmr.msra.gmra.mxu0 %vm89_vm0, %v68_v5 }
  0x18   :  { %178 = vmatpush.bf16.msra.mxu1 %v256_v6 }
  0x1c   :  { %179 = vmatpush.bf16.msra.mxu1 %v255_v7 }
  0x20   :  { %180 = vmatpush.bf16.msra.mxu1 %v254_v8 }
  0x24   :  { %181 = vmatpush.bf16.msra.mxu1 %v253_v9 }
  0x28   :  { %182 = vmatpush.bf16.msra.mxu1 %v252_v10 }
  0x2c   :  { %183 = vmatpush.bf16.msra.mxu1 %v251_v11 }
  0x93   :  { %v102_v13 = vpop.f32.mrf.mxu0 }
  0x94   :  { %v103_v14 = vadd.f32 %v265_v12, %v102_v13 }
  0x96   :  { %v106_v15 = vmax.f32 %v103_v14, 0.0 }
  0x98   :  { %v107_v16 = vpack.c.bf16 %v106_v15, %v106_v15 }
  0x9a   :  { %184 = vmatmul.bf16.vlgmr.msra.gmra.mxu1 %v107_v16 }
  0x9b   :  { %v104_v17 = vpop.f32.mrf.mxu0 }
 0x117   :  { %v185_v19 = vpop.f32.mrf.mxu1 }
 0x118   :  { %v186_v20 = vadd.f32 %v266_v18, %v185_v19 }
 0x11a   :  { %189 = vst [vmem:[#allocation8] sm:$0xff] %v186_v20 }
 0x11b   :  { %200 = dma.vmem_to_hbm [thread:$0]  %s196_s12, 128, %s198_s15, [#allocation4]  }
 0x11f   :  { %v187_v21 = vpop.f32.mrf.mxu1 }
 0x120   :  { %367 = dma.done.wait [#allocation4], 128  }
 0x121   :  { %368 = vsyncadd [#allocation4], 4294967168 }
 0x122   :  { %205 = vsyncpa [#allocation3], 1 }
 0x123   :  { %206 = vsyncpa [#allocation6], 1 }
 0x124   :  { %207 = vsyncpa [#allocation4], 1 }

</bundles_post_ra>
